<compile_context>
chip_gen: v5e
topology: v5e:2x2
jax: 0.10.0
libtpu: 0.0.40
codegen_flags: <defaults>
</compile_context>

<pallas_src>
import functools

import jax
import jax.numpy as jnp
from jax.experimental import pallas as pl
from jax.experimental.pallas import tpu as pltpu


def _round_up(x, m):
    return ((x + m - 1) // m) * m


def _pick_tile_b(batch):
    """Adaptive batch tile.

    * tiny batches: round up to the 8-row sublane minimum (don't push 100+
      padding rows through 4 matmuls + transcendentals).
    * otherwise: split into >= 2 grid steps (v7x has 2 TensorCores; also lets
      the pipeline overlap DMA with compute) and cap the tile at 512 rows to
      amortize the ~0.35 us/step grid overhead while staying VMEM-friendly.
    """
    if batch <= 8:
        return 8
    return min(512, _round_up(pl.cdiv(batch, 2), 8))


def vae_forward_kernel(
    x_ref, y_ref,
    w1_ref, b1_ref,        # encoder Linear(D_in, D_h)                (bf16 W, f32 b)
    wmv_ref, bmv_ref,      # fused [Wm || Wv] : (D_h, 2*D_z)           (bf16 W, f32 b)
    wd1_ref, bd1_ref,      # decoder Linear(D_z, D_h), Wd1 zero-padded to (2*D_z, D_h)
    wd2_ref, bd2_ref,      # decoder Linear(D_h, D_in)
    yprd_ref, loss_ref,
    *, batch, tile_b, d_z, needs_mask,
):
    x = x_ref[...]                                  # bf16 (TILE_B, D_in)
    y = y_ref[...].astype(jnp.float32)              # 0/1 targets back to f32 for BCE

    # ---- encoder ----
    # bf16 operands into every MXU matmul, f32 accumulation; elementwise math
    # stays f32 (v5e VPU/EUP have no bf16 datapath).
    h = jnp.dot(x, w1_ref[...], preferred_element_type=jnp.float32) + b1_ref[...]
    h = jnp.maximum(h, 0.0)

    # Fused mean / log_var projection: one lane-dense 2*D_z-wide matmul.
    mv = jnp.dot(h.astype(jnp.bfloat16), wmv_ref[...],
                 preferred_element_type=jnp.float32) + bmv_ref[...]

    # ---- sample + decoder ----
    # TODO(synk): training-mode reparameterization (randn * exp(0.5*log_var) + mean)
    # would use pltpu.prng_seed / prng_random_bits; eval-mode semantics (z = mean)
    # implemented here.
    # mv @ [Wd1 ; 0] == mean @ Wd1 -> no 64-lane slice, contraction stays 128 lanes.
    hd = jnp.dot(mv.astype(jnp.bfloat16), wd1_ref[...],
                 preferred_element_type=jnp.float32) + bd1_ref[...]
    hd = jnp.maximum(hd, 0.0)
    logits = jnp.dot(hd.astype(jnp.bfloat16), wd2_ref[...],
                     preferred_element_type=jnp.float32) + bd2_ref[...]

    # ---- sigmoid + BCE sharing one exp(-|l|) (cuts EUP transcendental load) ----
    e = jnp.exp(-jnp.abs(logits))                   # single EUP exp per element
    r = pl.reciprocal(1.0 + e, approx=True)         # EUP vrcp slot, ~free
    # sigmoid(l) = r for l >= 0, e*r for l < 0.
    y_prd = jnp.where(logits >= 0.0, r, e * r)
    yprd_ref[...] = y_prd

    # Stable BCE from logits: max(l,0) - l*y + log(1 + exp(-|l|)).
    # (jnp.log(1+e) kept over log1p for guaranteed Mosaic lowering; precision
    #  delta is ~1e-7 per element, irrelevant at this loss scale.)
    bce_el = jnp.maximum(logits, 0.0) - logits * y + jnp.log(1.0 + e)

    # ---- KLD on the full lane-dense (TILE_B, 2*D_z) mv (no 64-lane slices) ----
    # lanes [0, D_z)    -> mean    : contribute -(mean^2)
    # lanes [D_z, 2D_z) -> log_var : contribute 1 + log_var - exp(log_var)
    lane = jax.lax.broadcasted_iota(jnp.int32, mv.shape, 1)
    kld_el = jnp.where(lane >= d_z, 1.0 + mv - jnp.exp(mv), -(mv * mv))

    # ---- per-tile partial loss (SMEM scalar; summed in the wrapper) ----
    if needs_mask:
        rows = pl.program_id(0) * tile_b + jax.lax.broadcasted_iota(
            jnp.int32, (tile_b, 1), 0)
        valid = (rows < batch).astype(jnp.float32)          # (TILE_B, 1)
        bce = jnp.sum(valid * bce_el)
        kld = -0.5 * jnp.sum(valid * kld_el)
    else:
        bce = jnp.sum(bce_el)
        kld = -0.5 * jnp.sum(kld_el)

    loss_ref[0, 0] = bce + kld


@functools.partial(jax.jit, static_argnames=("tile_b",))
def vae_forward(x, y, params, tile_b=None):
    B, D_in = x.shape
    D_h = params["w1"].shape[1]
    D_z = params["wm"].shape[1]

    TILE_B = int(tile_b) if tile_b is not None else _pick_tile_b(B)
    assert TILE_B % 8 == 0, "batch tile must be a multiple of 8 (sublane)"

    # ---- fuse / pad / downcast parameters once in the wrapper (not in-kernel) ----
    bf16 = jnp.bfloat16
    w1 = params["w1"].astype(bf16)                                       # (D_in, D_h)
    wmv = jnp.concatenate([params["wm"], params["wv"]], axis=1).astype(bf16)  # (D_h, 2*D_z)
    bmv = jnp.concatenate([params["bm"], params["bv"]], axis=1)          # (1, 2*D_z) f32
    wd1_pad = jnp.concatenate(
        [params["wd1"], jnp.zeros((D_z, D_h), params["wd1"].dtype)],
        axis=0).astype(bf16)                                             # (2*D_z, D_h)
    wd2 = params["wd2"].astype(bf16)                                     # (D_h, D_in)

    # bf16 activations: halves the x/y HBM streams and feeds the MXU at full
    # bf16 rate; y holds 0/1 targets so bf16 is exact.
    x = x.astype(bf16)
    y = y.astype(bf16)

    # ---- pad batch to a multiple of TILE_B ----
    grid_b = pl.cdiv(B, TILE_B)
    B_pad = grid_b * TILE_B
    if B_pad != B:
        x = jnp.pad(x, ((0, B_pad - B), (0, 0)))
        y = jnp.pad(y, ((0, B_pad - B), (0, 0)))

    # ---- specs ----
    def tiled(arr):
        return pl.BlockSpec((TILE_B, arr.shape[1]), lambda i: (i, 0))

    def resident(arr):
        # Weights/biases are tiny here, so default double-buffering is kept;
        # on v7x (64 MiB VMEM) pipeline_mode=pl.Buffered(1) would halve their
        # resident footprint if the model dims grow.
        nd = arr.ndim
        return pl.BlockSpec(arr.shape, lambda i: (0,) * nd)

    in_arrays = (
        x, y,
        w1, params["b1"],
        wmv, bmv,
        wd1_pad, params["bd1"],
        wd2, params["bd2"],
    )
    in_specs = [tiled(x), tiled(y)] + [resident(a) for a in in_arrays[2:]]

    out_shape = (
        jax.ShapeDtypeStruct((B_pad, D_in), jnp.float32),   # y_prd (padded)
        jax.ShapeDtypeStruct((grid_b, 1), jnp.float32),     # per-tile partial loss
    )
    out_specs = (
        pl.BlockSpec((TILE_B, D_in), lambda i: (i, 0)),
        pl.BlockSpec((1, 1), lambda i: (i, 0),
                     memory_space=pltpu.MemorySpace.SMEM),
    )

    # ---- VMEM budget from actual buffer sizes (not a flat 32 MiB) ----
    param_bytes = sum(int(a.size) * a.dtype.itemsize for a in in_arrays[2:])
    tile_io_bytes = TILE_B * D_in * (2 + 2 + 4)        # x, y (bf16) + y_prd (f32)
    vmem_limit = int(2 * tile_io_bytes                 # double-buffered batch tiles
                     + 2 * param_bytes                 # double-buffered residents
                     + (8 << 20))                      # intermediates / headroom
    vmem_limit = min(vmem_limit, 100 * 1024 * 1024)

    # ---- advisory cost estimate ----
    flops = 2 * B_pad * (D_in * D_h + D_h * (2 * D_z) + (2 * D_z) * D_h + D_h * D_in)
    transcendentals = B_pad * (2 * D_in + 2 * D_z)     # exp + log per recon elem, exp(mv)
    bytes_accessed = (2 * 2 * B_pad * D_in             # x, y bf16 in
                      + 4 * B_pad * D_in               # y_prd f32 out
                      + param_bytes + 4 * grid_b)

    kernel = functools.partial(
        vae_forward_kernel, batch=B, tile_b=TILE_B, d_z=D_z,
        needs_mask=(B_pad != B))

    y_prd_pad, loss_parts = pl.pallas_call(
        kernel,
        grid=(grid_b,),
        in_specs=in_specs,
        out_specs=out_specs,
        out_shape=out_shape,
        compiler_params=pltpu.CompilerParams(
            dimension_semantics=("parallel",),
            vmem_limit_bytes=vmem_limit,
        ),
        cost_estimate=pl.CostEstimate(
            flops=flops,
            transcendentals=transcendentals,
            bytes_accessed=bytes_accessed,
        ),
    )(*in_arrays)

    return y_prd_pad[:B], jnp.sum(loss_parts)


def vae_forward_ref(x, y, params):
    """Pure-JAX f32 reference (same eval-mode semantics, logits-based BCE)."""
    hp = jax.lax.Precision.HIGHEST
    h = jax.nn.relu(jnp.dot(x, params["w1"], precision=hp) + params["b1"])
    mean = jnp.dot(h, params["wm"], precision=hp) + params["bm"]
    log_var = jnp.dot(h, params["wv"], precision=hp) + params["bv"]
    z = mean
    hd = jax.nn.relu(jnp.dot(z, params["wd1"], precision=hp) + params["bd1"])
    logits = jnp.dot(hd, params["wd2"], precision=hp) + params["bd2"]
    y_prd = jax.nn.sigmoid(logits)
    bce = jnp.sum(jnp.maximum(logits, 0.0) - logits * y
                  + jnp.log(1.0 + jnp.exp(-jnp.abs(logits))))
    kld = -0.5 * jnp.sum(1.0 + log_var - mean * mean - jnp.exp(log_var))
    return y_prd, bce + kld


def init_params(key, D_in, D_h, D_z):
    """nn.Linear-style init U(-1/sqrt(fan_in), 1/sqrt(fan_in)).
    Weights stored [in_features, out_features]; biases [1, out_features]."""
    def linear(key, fan_in, fan_out):
        kw, kb = jax.random.split(key)
        bound = 1.0 / jnp.sqrt(fan_in)
        w = jax.random.uniform(kw, (fan_in, fan_out), jnp.float32, -bound, bound)
        b = jax.random.uniform(kb, (1, fan_out), jnp.float32, -bound, bound)
        return w, b

    k1, k2, k3, k4, k5 = jax.random.split(key, 5)
    w1, b1 = linear(k1, D_in, D_h)      # enc Linear(D_in, D_h)
    wm, bm = linear(k2, D_h, D_z)       # mean_fc
    wv, bv = linear(k3, D_h, D_z)       # log_var_fc
    wd1, bd1 = linear(k4, D_z, D_h)     # dec Linear(D_z, D_h)
    wd2, bd2 = linear(k5, D_h, D_in)    # dec Linear(D_h, D_in)
    return dict(w1=w1, b1=b1, wm=wm, bm=bm, wv=wv, bv=bv,
                wd1=wd1, bd1=bd1, wd2=wd2, bd2=bd2)


if __name__ == "__main__":
    D_in, D_h, D_z = 256, 128, 64

    key = jax.random.PRNGKey(0)
    k_params, k_x, k_y, k_x2, k_y2 = jax.random.split(key, 5)
    params = init_params(k_params, D_in, D_h, D_z)

    def check(B, kx, ky):
        x = jax.random.uniform(kx, (B, D_in), jnp.float32)          # inputs in [0,1)
        y = (jax.random.uniform(ky, (B, D_in), jnp.float32) > 0.5).astype(jnp.float32)
        y_prd, loss = vae_forward(x, y, params)
        jax.block_until_ready((y_prd, loss))
        y_ref, loss_ref = vae_forward_ref(x, y, params)
        assert y_prd.shape == (B, D_in)
        assert y_prd.dtype == jnp.float32
        assert loss.shape == ()
        assert bool(jnp.isfinite(loss))
        # bf16 matmul operands -> slightly looser tolerances vs the f32 reference
        assert bool(jnp.allclose(y_prd, y_ref, atol=3e-2, rtol=2e-2))
        assert bool(jnp.allclose(loss, loss_ref, atol=2.0, rtol=3e-2))

    check(8, k_x, k_y)      # single-tile path (TILE_B = 8, no padding)
    check(20, k_x2, k_y2)   # multi-tile path with batch padding + row masking

    print("KERNEL_OK")
</pallas_src>

<mosaic_0001>
module attributes {stable_mosaic.version = 11 : i64} {
  func.func @vae_forward_kernel(%arg0: i32, %arg1: memref<8x256xbf16, #tpu.memory_space<vmem>>, %arg2: memref<8x256xbf16, #tpu.memory_space<vmem>>, %arg3: memref<256x128xbf16, #tpu.memory_space<vmem>>, %arg4: memref<1x128xf32, #tpu.memory_space<vmem>>, %arg5: memref<128x128xbf16, #tpu.memory_space<vmem>>, %arg6: memref<1x128xf32, #tpu.memory_space<vmem>>, %arg7: memref<128x128xbf16, #tpu.memory_space<vmem>>, %arg8: memref<1x128xf32, #tpu.memory_space<vmem>>, %arg9: memref<128x256xbf16, #tpu.memory_space<vmem>>, %arg10: memref<1x256xf32, #tpu.memory_space<vmem>>, %arg11: memref<8x256xf32, #tpu.memory_space<vmem>>, %arg12: memref<1x1xf32, #tpu.memory_space<smem>>) attributes {dimension_semantics = [#tpu.dimension_semantics<parallel>], iteration_bounds = array<i64: 1>, scalar_prefetch = 0 : i64, scratch_operands = 0 : i64, tpu.core_type = #tpu.core_type<tc>, window_params = [{transform_indices = @transform_0, window_bounds = array<i64: 8, 256>}, {transform_indices = @transform_1, window_bounds = array<i64: 8, 256>}, {pipeline_mode = #tpu.pipeline_mode<synchronous>, transform_indices = @transform_2, window_bounds = array<i64: 256, 128>}, {pipeline_mode = #tpu.pipeline_mode<synchronous>, transform_indices = @transform_3, window_bounds = array<i64: 1, 128>}, {pipeline_mode = #tpu.pipeline_mode<synchronous>, transform_indices = @transform_4, window_bounds = array<i64: 128, 128>}, {pipeline_mode = #tpu.pipeline_mode<synchronous>, transform_indices = @transform_5, window_bounds = array<i64: 1, 128>}, {pipeline_mode = #tpu.pipeline_mode<synchronous>, transform_indices = @transform_6, window_bounds = array<i64: 128, 128>}, {pipeline_mode = #tpu.pipeline_mode<synchronous>, transform_indices = @transform_7, window_bounds = array<i64: 1, 128>}, {pipeline_mode = #tpu.pipeline_mode<synchronous>, transform_indices = @transform_8, window_bounds = array<i64: 128, 256>}, {pipeline_mode = #tpu.pipeline_mode<synchronous>, transform_indices = @transform_9, window_bounds = array<i64: 1, 256>}, {transform_indices = @transform_10, window_bounds = array<i64: 8, 256>}, {transform_indices = @transform_11, window_bounds = array<i64: 1, 1>}]} {
    %c0 = arith.constant 0 : index
    %c0_0 = arith.constant 0 : index
    %0 = vector.load %arg1[%c0, %c0_0] : memref<8x256xbf16, #tpu.memory_space<vmem>>, vector<8x256xbf16>
    %c0_1 = arith.constant 0 : index
    %c0_2 = arith.constant 0 : index
    %1 = vector.load %arg2[%c0_1, %c0_2] : memref<8x256xbf16, #tpu.memory_space<vmem>>, vector<8x256xbf16>
    %2 = arith.extf %1 : vector<8x256xbf16> to vector<8x256xf32>
    %c0_3 = arith.constant 0 : index
    %c0_4 = arith.constant 0 : index
    %3 = vector.load %arg3[%c0_3, %c0_4] : memref<256x128xbf16, #tpu.memory_space<vmem>>, vector<256x128xbf16>
    %cst = arith.constant dense<0.000000e+00> : vector<8x128xf32>
    %4 = tpu.matmul %0, %3, %cst {dimension_numbers = #tpu.dot_dimension_numbers<[1], [0], [0], [1], [0, 0, 1, 1], [], []>} : vector<8x256xbf16>, vector<256x128xbf16>, vector<8x128xf32> -> vector<8x128xf32>
    %c0_5 = arith.constant 0 : index
    %c0_6 = arith.constant 0 : index
    %5 = vector.load %arg4[%c0_5, %c0_6] : memref<1x128xf32, #tpu.memory_space<vmem>>, vector<1x128xf32>
    %6 = vector.broadcast %5 : vector<1x128xf32> to vector<8x128xf32>
    %7 = arith.addf %4, %6 : vector<8x128xf32>
    %cst_7 = arith.constant 0.000000e+00 : f32
    %8 = vector.broadcast %cst_7 : f32 to vector<8x128xf32>
    %9 = arith.maximumf %7, %8 : vector<8x128xf32>
    %10 = arith.truncf %9 : vector<8x128xf32> to vector<8x128xbf16>
    %c0_8 = arith.constant 0 : index
    %c0_9 = arith.constant 0 : index
    %11 = vector.load %arg5[%c0_8, %c0_9] : memref<128x128xbf16, #tpu.memory_space<vmem>>, vector<128x128xbf16>
    %cst_10 = arith.constant dense<0.000000e+00> : vector<8x128xf32>
    %12 = tpu.matmul %10, %11, %cst_10 {dimension_numbers = #tpu.dot_dimension_numbers<[1], [0], [0], [1], [0, 0, 1, 1], [], []>} : vector<8x128xbf16>, vector<128x128xbf16>, vector<8x128xf32> -> vector<8x128xf32>
    %c0_11 = arith.constant 0 : index
    %c0_12 = arith.constant 0 : index
    %13 = vector.load %arg6[%c0_11, %c0_12] : memref<1x128xf32, #tpu.memory_space<vmem>>, vector<1x128xf32>
    %14 = vector.broadcast %13 : vector<1x128xf32> to vector<8x128xf32>
    %15 = arith.addf %12, %14 : vector<8x128xf32>
    %16 = arith.truncf %15 : vector<8x128xf32> to vector<8x128xbf16>
    %c0_13 = arith.constant 0 : index
    %c0_14 = arith.constant 0 : index
    %17 = vector.load %arg7[%c0_13, %c0_14] : memref<128x128xbf16, #tpu.memory_space<vmem>>, vector<128x128xbf16>
    %cst_15 = arith.constant dense<0.000000e+00> : vector<8x128xf32>
    %18 = tpu.matmul %16, %17, %cst_15 {dimension_numbers = #tpu.dot_dimension_numbers<[1], [0], [0], [1], [0, 0, 1, 1], [], []>} : vector<8x128xbf16>, vector<128x128xbf16>, vector<8x128xf32> -> vector<8x128xf32>
    %c0_16 = arith.constant 0 : index
    %c0_17 = arith.constant 0 : index
    %19 = vector.load %arg8[%c0_16, %c0_17] : memref<1x128xf32, #tpu.memory_space<vmem>>, vector<1x128xf32>
    %20 = vector.broadcast %19 : vector<1x128xf32> to vector<8x128xf32>
    %21 = arith.addf %18, %20 : vector<8x128xf32>
    %cst_18 = arith.constant 0.000000e+00 : f32
    %22 = vector.broadcast %cst_18 : f32 to vector<8x128xf32>
    %23 = arith.maximumf %21, %22 : vector<8x128xf32>
    %24 = arith.truncf %23 : vector<8x128xf32> to vector<8x128xbf16>
    %c0_19 = arith.constant 0 : index
    %c0_20 = arith.constant 0 : index
    %25 = vector.load %arg9[%c0_19, %c0_20] : memref<128x256xbf16, #tpu.memory_space<vmem>>, vector<128x256xbf16>
    %cst_21 = arith.constant dense<0.000000e+00> : vector<8x256xf32>
    %26 = tpu.matmul %24, %25, %cst_21 {dimension_numbers = #tpu.dot_dimension_numbers<[1], [0], [0], [1], [0, 0, 1, 1], [], []>} : vector<8x128xbf16>, vector<128x256xbf16>, vector<8x256xf32> -> vector<8x256xf32>
    %c0_22 = arith.constant 0 : index
    %c0_23 = arith.constant 0 : index
    %27 = vector.load %arg10[%c0_22, %c0_23] : memref<1x256xf32, #tpu.memory_space<vmem>>, vector<1x256xf32>
    %28 = vector.broadcast %27 : vector<1x256xf32> to vector<8x256xf32>
    %29 = arith.addf %26, %28 : vector<8x256xf32>
    %30 = math.absf %29 : vector<8x256xf32>
    %cst_24 = arith.constant 0.000000e+00 : f32
    %31 = vector.broadcast %cst_24 : f32 to vector<8x256xf32>
    %32 = arith.subf %31, %30 : vector<8x256xf32>
    %33 = math.exp %32 : vector<8x256xf32>
    %cst_25 = arith.constant 1.000000e+00 : f32
    %34 = vector.broadcast %cst_25 : f32 to vector<8x256xf32>
    %35 = arith.addf %34, %33 : vector<8x256xf32>
    %36 = tpu.reciprocal %35 {approx = true} : vector<8x256xf32> -> vector<8x256xf32>
    %cst_26 = arith.constant 0.000000e+00 : f32
    %37 = vector.broadcast %cst_26 : f32 to vector<8x256xf32>
    %38 = arith.cmpf oge, %29, %37 : vector<8x256xf32>
    %39 = arith.mulf %33, %36 : vector<8x256xf32>
    %40 = arith.select %38, %36, %39 : vector<8x256xi1>, vector<8x256xf32>
    %c0_27 = arith.constant 0 : index
    %c0_28 = arith.constant 0 : index
    %41 = vector.load %arg11[%c0_27, %c0_28] : memref<8x256xf32, #tpu.memory_space<vmem>>, vector<8x256xf32>
    tpu.vector_store %arg11[%c0_27, %c0_28], %40 {strides = array<i32>} : memref<8x256xf32, #tpu.memory_space<vmem>>, vector<8x256xf32>,
    %cst_29 = arith.constant 0.000000e+00 : f32
    %42 = vector.broadcast %cst_29 : f32 to vector<8x256xf32>
    %43 = arith.maximumf %29, %42 : vector<8x256xf32>
    %44 = arith.mulf %29, %2 : vector<8x256xf32>
    %45 = arith.subf %43, %44 : vector<8x256xf32>
    %cst_30 = arith.constant 1.000000e+00 : f32
    %46 = vector.broadcast %cst_30 : f32 to vector<8x256xf32>
    %47 = arith.addf %46, %33 : vector<8x256xf32>
    %48 = math.log %47 : vector<8x256xf32>
    %49 = arith.addf %45, %48 : vector<8x256xf32>
    %50 = tpu.iota {dimensions = array<i32: 1>} : vector<8x128xi32>
    %c64_i32 = arith.constant 64 : i32
    %51 = vector.broadcast %c64_i32 : i32 to vector<8x128xi32>
    %52 = arith.cmpi sge, %50, %51 : vector<8x128xi32>
    %cst_31 = arith.constant 1.000000e+00 : f32
    %53 = vector.broadcast %cst_31 : f32 to vector<8x128xf32>
    %54 = arith.addf %53, %15 : vector<8x128xf32>
    %55 = math.exp %15 : vector<8x128xf32>
    %56 = arith.subf %54, %55 : vector<8x128xf32>
    %57 = arith.mulf %15, %15 : vector<8x128xf32>
    %cst_32 = arith.constant 0.000000e+00 : f32
    %58 = vector.broadcast %cst_32 : f32 to vector<8x128xf32>
    %59 = arith.subf %58, %57 : vector<8x128xf32>
    %60 = arith.select %52, %56, %59 : vector<8x128xi1>, vector<8x128xf32>
    %61 = vector.shape_cast %49 : vector<8x256xf32> to vector<1x8x256xf32>
    %cst_33 = arith.constant dense<0.000000e+00> : vector<1xf32>
    %62 = vector.multi_reduction <add>, %61, %cst_33 [1, 2] : vector<1x8x256xf32> to vector<1xf32>
    %63 = vector.shape_cast %62 : vector<1xf32> to vector<1x1x1xf32>
    %64 = vector.extract %63[0, 0, 0] : f32 from vector<1x1x1xf32>
    %65 = vector.shape_cast %60 : vector<8x128xf32> to vector<1x8x128xf32>
    %cst_34 = arith.constant dense<0.000000e+00> : vector<1xf32>
    %66 = vector.multi_reduction <add>, %65, %cst_34 [1, 2] : vector<1x8x128xf32> to vector<1xf32>
    %67 = vector.shape_cast %66 : vector<1xf32> to vector<1x1x1xf32>
    %68 = vector.extract %67[0, 0, 0] : f32 from vector<1x1x1xf32>
    %cst_35 = arith.constant -5.000000e-01 : f32
    %69 = arith.mulf %cst_35, %68 : f32
    %70 = arith.addf %64, %69 : f32
    %c0_36 = arith.constant 0 : index
    %c0_37 = arith.constant 0 : index
    %71 = memref.load %arg12[%c0_36, %c0_37] : memref<1x1xf32, #tpu.memory_space<smem>>
    memref.store %70, %arg12[%c0_36, %c0_37] : memref<1x1xf32, #tpu.memory_space<smem>>
    return
  }
  func.func @transform_0(%arg0: i32) -> (i32, i32) {
    %c0_i32 = arith.constant 0 : i32
    %c0_i32_0 = arith.constant 0 : i32
    return %arg0, %c0_i32 : i32, i32
  }
  func.func @transform_1(%arg0: i32) -> (i32, i32) {
    %c0_i32 = arith.constant 0 : i32
    %c0_i32_0 = arith.constant 0 : i32
    return %arg0, %c0_i32 : i32, i32
  }
  func.func @transform_2(%arg0: i32) -> (i32, i32) {
    %c0_i32 = arith.constant 0 : i32
    %c0_i32_0 = arith.constant 0 : i32
    %c0_i32_1 = arith.constant 0 : i32
    return %c0_i32, %c0_i32_0 : i32, i32
  }
  func.func @transform_3(%arg0: i32) -> (i32, i32) {
    %c0_i32 = arith.constant 0 : i32
    %c0_i32_0 = arith.constant 0 : i32
    %c0_i32_1 = arith.constant 0 : i32
    return %c0_i32, %c0_i32_0 : i32, i32
  }
  func.func @transform_4(%arg0: i32) -> (i32, i32) {
    %c0_i32 = arith.constant 0 : i32
    %c0_i32_0 = arith.constant 0 : i32
    %c0_i32_1 = arith.constant 0 : i32
    return %c0_i32, %c0_i32_0 : i32, i32
  }
  func.func @transform_5(%arg0: i32) -> (i32, i32) {
    %c0_i32 = arith.constant 0 : i32
    %c0_i32_0 = arith.constant 0 : i32
    %c0_i32_1 = arith.constant 0 : i32
    return %c0_i32, %c0_i32_0 : i32, i32
  }
  func.func @transform_6(%arg0: i32) -> (i32, i32) {
    %c0_i32 = arith.constant 0 : i32
    %c0_i32_0 = arith.constant 0 : i32
    %c0_i32_1 = arith.constant 0 : i32
    return %c0_i32, %c0_i32_0 : i32, i32
  }
  func.func @transform_7(%arg0: i32) -> (i32, i32) {
    %c0_i32 = arith.constant 0 : i32
    %c0_i32_0 = arith.constant 0 : i32
    %c0_i32_1 = arith.constant 0 : i32
    return %c0_i32, %c0_i32_0 : i32, i32
  }
  func.func @transform_8(%arg0: i32) -> (i32, i32) {
    %c0_i32 = arith.constant 0 : i32
    %c0_i32_0 = arith.constant 0 : i32
    %c0_i32_1 = arith.constant 0 : i32
    return %c0_i32, %c0_i32_0 : i32, i32
  }
  func.func @transform_9(%arg0: i32) -> (i32, i32) {
    %c0_i32 = arith.constant 0 : i32
    %c0_i32_0 = arith.constant 0 : i32
    %c0_i32_1 = arith.constant 0 : i32
    return %c0_i32, %c0_i32_0 : i32, i32
  }
  func.func @transform_10(%arg0: i32) -> (i32, i32) {
    %c0_i32 = arith.constant 0 : i32
    %c0_i32_0 = arith.constant 0 : i32
    return %arg0, %c0_i32 : i32, i32
  }
  func.func @transform_11(%arg0: i32) -> (i32, i32) {
    %c0_i32 = arith.constant 0 : i32
    %c0_i32_0 = arith.constant 0 : i32
    return %arg0, %c0_i32 : i32, i32
  }
}

</mosaic_0001>

<bundles_post_ra>
// kernel: vae_forward.1
= control target key start
LH: loop header
LB: loop body
LE: loop exit
PB: predicated region body
PF: predicated region fallthrough
CT: control target
= control target key end

     0   :  { %17 = vsyncpa [#allocation3], 0  ;;  %s1188_s0 = inlined_call_operand.vmem [shape: bf16[8,256], index: 0, kind: input, shape index: {}]   ;;  %s1189_s1 = inlined_call_operand.vmem [shape: bf16[8,256], index: 1, kind: input, shape index: {}]   ;;  %s1190_s2 = inlined_call_operand.vmem [shape: bf16[256,128], index: 2, kind: input, shape index: {}]   ;;  %s1191_s3 = inlined_call_operand.vmem [shape: f32[1,128], index: 3, kind: input, shape index: {}]   ;;  %s1192_s4 = inlined_call_operand.vmem [shape: bf16[128,128], index: 4, kind: input, shape index: {}]   ;;  %s1193_s5 = inlined_call_operand.vmem [shape: f32[1,128], index: 5, kind: input, shape index: {}]   ;;  %s1194_s6 = inlined_call_operand.vmem [shape: bf16[128,128], index: 6, kind: input, shape index: {}]   ;;  %s1195_s7 = inlined_call_operand.vmem [shape: f32[1,128], index: 7, kind: input, shape index: {}]   ;;  %s1196_s8 = inlined_call_operand.vmem [shape: bf16[128,256], index: 8, kind: input, shape index: {}]   ;;  %s1197_s9 = inlined_call_operand.vmem [shape: f32[1,256], index: 9, kind: input, shape index: {}]   ;;  %s1198_s10 = inlined_call_operand.hbm [shape: f32[8,256], index: 10, kind: output, shape index: {0}]   ;;  %s1199_s11 = inlined_call_operand.hbm [shape: f32[1,1], index: 11, kind: output, shape index: {1}]  }
   0x1   :  { %v798_v0 = vld [vmem:[%s1190_s2 + $0x38] sm:$0xff]  ;;  %v797_v2 = vld [vmem:[%s1190_s2 + $0x30] sm:$0xff]  ;;  %v796_v5 = vld [vmem:[%s1190_s2 + $0x28] sm:$0xff] }
   0x2   :  { %v806_v1 = vld [vmem:[%s1190_s2 + $0x78] sm:$0xff]  ;;  %182 = vmatpush.bf16.msra.mxu0 %v798_v0  ;;  %v805_v3 = vld [vmem:[%s1190_s2 + $0x70] sm:$0xff]  ;;  %v804_v6 = vld [vmem:[%s1190_s2 + $0x68] sm:$0xff] }
   0x3   :  { %195 = vmatpush.bf16.msra.mxu1 %v806_v1  ;;  %v814_v4 = vld [vmem:[%s1192_s4 + $0x38] sm:$0xff]  ;;  %v813_v7 = vld [vmem:[%s1192_s4 + $0x30] sm:$0xff] }
   0x4   :  { %278 = vmatpush.bf16.msra.mxu2 %v814_v4 }
   0x6   :  { %183 = vmatpush.bf16.msra.mxu0 %v797_v2 }
   0x7   :  { %196 = vmatpush.bf16.msra.mxu1 %v805_v3 }
   0x8   :  { %18 = vsyncpa [#allocation4], 0  ;;  %v795_v8 = vld [vmem:[%s1190_s2 + $0x20] sm:$0xff]  ;;  %279 = vmatpush.bf16.msra.mxu2 %v813_v7  ;;  %v812_v10 = vld [vmem:[%s1192_s4 + $0x28] sm:$0xff]  ;;  %s575_s24 = sshll.u32 %s1198_s10, 4  ;;  %s584_s26 = sshll.u32 %s1199_s11, 4  ;;  %s576_s24 = int_to_ptr.hbm [resolvable:$true] %s575_s24  ;;  %s585_s26 = int_to_ptr.hbm [resolvable:$true] %s584_s26 }
   0x9   :  { %v803_v9 = vld [vmem:[%s1190_s2 + $0x60] sm:$0xff]  ;;  %v794_v11 = vld [vmem:[%s1190_s2 + $0x18] sm:$0xff]  ;;  %v793_v14 = vld [vmem:[%s1190_s2 + $0x10] sm:$0xff]  ;;  %s903_s29 = smov [#allocation5]  }
   0xa   :  { %184 = vmatpush.bf16.msra.mxu0 %v796_v5  ;;  %v802_v12 = vld [vmem:[%s1190_s2 + $0x58] sm:$0xff]  ;;  %v811_v13 = vld [vmem:[%s1192_s4 + $0x20] sm:$0xff]  ;;  %v801_v15 = vld [vmem:[%s1190_s2 + $0x50] sm:$0xff] }
   0xb   :  { %197 = vmatpush.bf16.msra.mxu1 %v804_v6  ;;  %v810_v16 = vld [vmem:[%s1192_s4 + $0x18] sm:$0xff]  ;;  %v792_v17 = vld [vmem:[%s1190_s2 + $0x8] sm:$0xff]  ;;  %v39_v19 = vld [vmem:[%s1188_s0] sm:$0xff] }
   0xc   :  { %280 = vmatpush.bf16.msra.mxu2 %v812_v10  ;;  %v800_v18 = vld [vmem:[%s1190_s2 + $0x48] sm:$0xff]  ;;  %v809_v20 = vld [vmem:[%s1192_s4 + $0x10] sm:$0xff]  ;;  %v80_v21 = vunpack.c.l.b16 %v39_v19  ;;  %v81_v22 = vunpack.c.h.b16 %v39_v19  ;;  %v791_v23 = vld [vmem:[%s1190_s2] sm:$0xff] }
   0xd   :  { %v799_v24 = vld [vmem:[%s1190_s2 + $0x40] sm:$0xff]  ;;  %v808_v27 = vld [vmem:[%s1192_s4 + $0x8] sm:$0xff]  ;;  %v822_v29 = vld [vmem:[%s1194_s6 + $0x38] sm:$0xff] }
   0xe   :  { %185 = vmatpush.bf16.msra.mxu0 %v795_v8  ;;  %v82_v25 = vpack.c.b16 %v80_v21, %v80_v21  ;;  %v83_v26 = vpack.c.b16 %v81_v22, %v81_v22  ;;  %v807_v28 = vld [vmem:[%s1192_s4] sm:$0xff]  ;;  %360 = vmatpush.bf16.msra.mxu3 %v822_v29  ;;  %v821_v30 = vld [vmem:[%s1194_s6 + $0x30] sm:$0xff]  ;;  %v820_v31 = vld [vmem:[%s1194_s6 + $0x28] sm:$0xff] }
   0xf   :  { %198 = vmatpush.bf16.msra.mxu1 %v803_v9  ;;  %v819_v32 = vld [vmem:[%s1194_s6 + $0x20] sm:$0xff]  ;;  %v818_v33 = vld [vmem:[%s1194_s6 + $0x18] sm:$0xff]  ;;  %v817_v34 = vld [vmem:[%s1194_s6 + $0x10] sm:$0xff] }
  0x10   :  { %281 = vmatpush.bf16.msra.mxu2 %v811_v13  ;;  %v845_v35 = vld [vmem:[%s1191_s3] ss:$0 sm:$0xff]  ;;  %v816_v36 = vld [vmem:[%s1194_s6 + $0x8] sm:$0xff]  ;;  %v785_v46 = vld [vmem:[%s1196_s8 + $0x70] sm:$0xf] }
  0x11   :  { %v815_v45 = vld [vmem:[%s1194_s6] sm:$0xff]  ;;  %v838_v47 = vld [vmem:[%s1196_s8 + $0x74] sm:$0xf0]  ;;  %v837_v48 = vld [vmem:[%s1196_s8 + $0x74] sm:$0xf] }
  0x12   :  { %186 = vmatpush.bf16.msra.mxu0 %v794_v11  ;;  %361 = vmatpush.bf16.msra.mxu3 %v821_v30  ;;  %v786_v49 = vor.u32 %v838_v47, %v785_v46  ;;  %v787_v50 = vld [vmem:[%s1196_s8 + $0x78] sm:$0xf0]  ;;  %v777_v51 = vld [vmem:[%s1196_s8 + $0x60] sm:$0xf]  ;;  %v836_v52 = vld [vmem:[%s1196_s8 + $0x64] sm:$0xf0] }
  0x13   :  { %199 = vmatpush.bf16.msra.mxu1 %v802_v12  ;;  %v790_v53 = vor.u32 %v837_v48, %v787_v50  ;;  %v835_v54 = vld [vmem:[%s1196_s8 + $0x64] sm:$0xf]  ;;  %v779_v55 = vld [vmem:[%s1196_s8 + $0x68] sm:$0xf0]  ;;  %v778_v56 = vor.u32 %v836_v52, %v777_v51  ;;  %v769_v58 = vld [vmem:[%s1196_s8 + $0x50] sm:$0xf] }
  0x14   :  { %282 = vmatpush.bf16.msra.mxu2 %v810_v16  ;;  %v782_v57 = vor.u32 %v835_v54, %v779_v55  ;;  %v834_v59 = vld [vmem:[%s1196_s8 + $0x54] sm:$0xf0]  ;;  %v833_v60 = vld [vmem:[%s1196_s8 + $0x54] sm:$0xf]  ;;  %v771_v61 = vld [vmem:[%s1196_s8 + $0x58] sm:$0xf0] }
  0x15   :  { %v770_v62 = vor.u32 %v834_v59, %v769_v58  ;;  %v774_v63 = vor.u32 %v833_v60, %v771_v61  ;;  %v761_v0 = vld [vmem:[%s1196_s8 + $0x40] sm:$0xf]  ;;  %v832_v1 = vld [vmem:[%s1196_s8 + $0x44] sm:$0xf0]  ;;  %v831_v2 = vld [vmem:[%s1196_s8 + $0x44] sm:$0xf] }
  0x16   :  { %187 = vmatpush.bf16.msra.mxu0 %v793_v14  ;;  %362 = vmatpush.bf16.msra.mxu3 %v820_v31  ;;  %v763_v3 = vld [vmem:[%s1196_s8 + $0x48] sm:$0xf0]  ;;  %v762_v4 = vor.u32 %v832_v1, %v761_v0  ;;  %v753_v6 = vld [vmem:[%s1196_s8 + $0x30] sm:$0xf]  ;;  %v830_v7 = vld [vmem:[%s1196_s8 + $0x34] sm:$0xf0] }
  0x17   :  { %200 = vmatpush.bf16.msra.mxu1 %v801_v15  ;;  %v766_v5 = vor.u32 %v831_v2, %v763_v3  ;;  %v829_v8 = vld [vmem:[%s1196_s8 + $0x34] sm:$0xf]  ;;  %v755_v9 = vld [vmem:[%s1196_s8 + $0x38] sm:$0xf0]  ;;  %v754_v10 = vor.u32 %v830_v7, %v753_v6  ;;  %v745_v12 = vld [vmem:[%s1196_s8 + $0x20] sm:$0xf] }
  0x18   :  { %283 = vmatpush.bf16.msra.mxu2 %v809_v20  ;;  %v758_v11 = vor.u32 %v829_v8, %v755_v9  ;;  %v828_v13 = vld [vmem:[%s1196_s8 + $0x24] sm:$0xf0]  ;;  %v827_v14 = vld [vmem:[%s1196_s8 + $0x24] sm:$0xf]  ;;  %v747_v15 = vld [vmem:[%s1196_s8 + $0x28] sm:$0xf0] }
  0x19   :  { %v746_v16 = vor.u32 %v828_v13, %v745_v12  ;;  %v729_v29 = vld [vmem:[%s1196_s8] sm:$0xf]  ;;  %v824_v30 = vld [vmem:[%s1196_s8 + $0x4] sm:$0xf0]  ;;  %v823_v31 = vld [vmem:[%s1196_s8 + $0x4] sm:$0xf] }
  0x1a   :  { %188 = vmatpush.bf16.msra.mxu0 %v792_v17  ;;  %363 = vmatpush.bf16.msra.mxu3 %v819_v32  ;;  %v750_v17 = vor.u32 %v827_v14, %v747_v15  ;;  %v730_v32 = vor.u32 %v824_v30, %v729_v29 }
  0x1b   :  { %201 = vmatpush.bf16.msra.mxu1 %v800_v18  ;;  %v846_v18 = vld [vmem:[%s1193_s5] ss:$0 sm:$0xff] }
  0x1c   :  { %284 = vmatpush.bf16.msra.mxu2 %v808_v27  ;;  %v739_v27 = vld [vmem:[%s1196_s8 + $0x18] sm:$0xf0] }
  0x1e   :  { %189 = vmatpush.bf16.msra.mxu0 %v791_v23  ;;  %364 = vmatpush.bf16.msra.mxu3 %v818_v33  ;;  %v737_v23 = vld [vmem:[%s1196_s8 + $0x10] sm:$0xf]  ;;  %v731_v33 = vld [vmem:[%s1196_s8 + $0x8] sm:$0xf0] }
  0x1f   :  { %202 = vmatpush.bf16.msra.mxu1 %v799_v24  ;;  %v826_v24 = vld [vmem:[%s1196_s8 + $0x14] sm:$0xf0] }
  0x20   :  { %285 = vmatpush.bf16.msra.mxu2 %v807_v28 }
  0x21   :  { %190 = vmatmul.bf16.vlgmr.msra.gmra.mxu0 %v82_v25  ;;  %v825_v25 = vld [vmem:[%s1196_s8 + $0x14] sm:$0xf] }
  0x22   :  { %203 = vmatmul.bf16.vlgmr.msra.gmra.mxu1 %v83_v26  ;;  %365 = vmatpush.bf16.msra.mxu3 %v817_v34  ;;  %v738_v26 = vor.u32 %v826_v24, %v737_v23  ;;  %v742_v28 = vor.u32 %v825_v25, %v739_v27  ;;  %v734_v34 = vor.u32 %v823_v31, %v731_v33 }
  0x23   :  { %477 = vmatpush.bf16.msrb.mxu0 %v786_v49  ;;  %490 = vmatpush.bf16.msrb.mxu1 %v790_v53 }
  0x26   :  { %366 = vmatpush.bf16.msra.mxu3 %v816_v36 }
  0x27   :  { %478 = vmatpush.bf16.msrb.mxu0 %v778_v56  ;;  %491 = vmatpush.bf16.msrb.mxu1 %v782_v57  ;;  %v40_v56 = vld [vmem:[%s1189_s1] sm:$0xff]  ;;  %s902_s1 = smov [#allocation2]  }
  0x28   :  { %v41_v60 = vunpack.c.l.bf16 %v40_v56 }
  0x2a   :  { %367 = vmatpush.bf16.msra.mxu3 %v815_v45 }
  0x2b   :  { %479 = vmatpush.bf16.msrb.mxu0 %v770_v62  ;;  %492 = vmatpush.bf16.msrb.mxu1 %v774_v63  ;;  %v42_v62 = vunpack.c.h.bf16 %v40_v56 }
  0x2f   :  { %480 = vmatpush.bf16.msrb.mxu0 %v762_v4  ;;  %493 = vmatpush.bf16.msrb.mxu1 %v766_v5 }
  0x33   :  { %481 = vmatpush.bf16.msrb.mxu0 %v754_v10  ;;  %494 = vmatpush.bf16.msrb.mxu1 %v758_v11 }
  0x37   :  { %482 = vmatpush.bf16.msrb.mxu0 %v746_v16  ;;  %495 = vmatpush.bf16.msrb.mxu1 %v750_v17  ;;  %v535_v17 = vlaneseq }
  0x3b   :  { %483 = vmatpush.bf16.msrb.mxu0 %v738_v26  ;;  %496 = vmatpush.bf16.msrb.mxu1 %v742_v28 }
  0x3f   :  { %484 = vmatpush.bf16.msrb.mxu0 %v730_v32  ;;  %497 = vmatpush.bf16.msrb.mxu1 %v734_v34 }
  0x9e   :  { %v191_v37 = vpop.f32.mrf.mxu0 }
  0x9f   :  { %v204_v38 = vpop.f32.mrf.mxu1  ;;  %v192_v39 = vadd.f32 %v845_v35, %v191_v37  ;;  %v847_v35 = vld [vmem:[%s1195_s7] ss:$0 sm:$0xff] }
  0xa1   :  { %v205_v40 = vadd.f32 %v204_v38, %v192_v39 }
  0xa3   :  { %v208_v41 = vmax.f32 %v205_v40, 0.0 }
  0xa5   :  { %v209_v42 = vpack.c.bf16 %v208_v41, %v208_v41  ;;  %v391_v41 = vld [vmem:[%s1197_s9] sm:$0x3]  ;;  %s573_s9 = sshll.u32 %s902_s1, 4  ;;  %s574_s9 = int_to_ptr.vmem [resolvable:$true] %s573_s9 }
  0xa6   :  { %v193_v43 = vpop.f32.mrf.mxu0 }
  0xa7   :  { %v206_v44 = vpop.f32.mrf.mxu1  ;;  %286 = vmatmul.bf16.vlgmr.msra.gmra.mxu2 %v209_v42  ;;  %v393_v42 = vperm.slane %v391_v41, 0  ;;  %v394_v43 = vperm.slane %v391_v41, 1 }
 0x12a   :  { %v287_v19 = vpop.f32.mrf.mxu2 }
 0x12b   :  { %v1141_v20 = vadd.f32 %v846_v18, %v287_v19 }
 0x12d   :  { %v291_v21 = vpack.c.bf16 %v1141_v20, %v1141_v20  ;;  %v539_v1 = vmul.f32 1.442695, %v1141_v20  ;;  %v538_v23 = vadd.f32 1.0, %v1141_v20  ;;  %v542_v24 = vmul.f32 %v1141_v20, %v1141_v20 }
 0x12f   :  { %368 = vmatmul.bf16.vlgmr.msra.gmra.mxu3 %v291_v21  ;;  %v543_v26 = vsub.f32 0.0, %v542_v24 }
 0x132   :  { %v289_v22 = vpop.f32.mrf.mxu2 }
 0x133   :  { %v536_v22 = vand.u32 127, %v535_v17 }
 0x135   :  { %vm537_vm2 = vcmp.ge.s32.totalorder %v536_v22, 64 }
 0x1b2   :  { %v369_v36 = vpop.f32.mrf.mxu3 }
 0x1b3   :  { %v370_v37 = vadd.f32 %v847_v35, %v369_v36 }
 0x1b5   :  { %v373_v38 = vmax.f32 %v370_v37, 0.0 }
 0x1b7   :  { %v374_v39 = vpack.c.bf16 %v373_v38, %v373_v38 }
 0x1b9   :  { %485 = vmatmul.bf16.vlgmr.msrb.gmra.mxu0 %v374_v39  ;;  %498 = vmatmul.bf16.vlgmr.msrb.gmra.mxu1 %v374_v39 }
 0x1ba   :  { %v371_v40 = vpop.f32.mrf.mxu3 }
 0x236   :  { %v486_v44 = vpop.f32.mrf.mxu0  ;;  %v499_v45 = vpop.f32.mrf.mxu1 }
 0x237   :  { %v487_v46 = vadd.f32 %v486_v44, %v393_v42  ;;  %v500_v47 = vadd.f32 %v499_v45, %v394_v43 }
 0x239   :  { %v503_v48 = vand.u32 2147483647, %v487_v46  ;;  %v504_v49 = vand.u32 2147483647, %v500_v47  ;;  %v523_v63 = vmax.f32 %v487_v46, 0.0  ;;  %v525_v0 = vmul.f32 %v487_v46, %v41_v60 }
 0x23a   :  { %v524_v2 = vmax.f32 %v500_v47, 0.0  ;;  %v526_v3 = vmul.f32 %v500_v47, %v42_v62  ;;  %vm516_vm0 = vcmp.ge.f32.partialorder %v500_v47, 0.0  ;;  %vm515_vm1 = vcmp.ge.f32.partialorder %v487_v46, 0.0 }
 0x23b   :  { %v505_v50 = vsub.f32 0.0, %v503_v48  ;;  %v506_v51 = vsub.f32 0.0, %v504_v49  ;;  %v527_v6 = vsub.f32 %v523_v63, %v525_v0 }
 0x23c   :  { %v528_v11 = vsub.f32 %v524_v2, %v526_v3 }
 0x23d   :  { %v507_v52 = vmul.f32 1.442695, %v505_v50  ;;  %v509_v53 = vmul.f32 1.442695, %v506_v51 }
 0x23e   :  { %v488_v54 = vpop.f32.mrf.mxu0  ;;  %v501_v55 = vpop.f32.mrf.mxu1 }
 0x23f   :  { %848 = vpow2.f32 %v507_v52 }
 0x240   :  { %850 = vpow2.f32 %v509_v53 }
 0x245   :  { %v849_v57 = vpop.eup %848 }
 0x246   :  { %v851_v58 = vpop.eup %850  ;;  %v511_v59 = vadd.f32 1.0, %v849_v57 }
 0x247   :  { %v512_v61 = vadd.f32 1.0, %v851_v58 }
 0x248   :  { %852 = vlog2.f32 %v511_v59 }
 0x249   :  { %854 = vrcp.f32 %v512_v61 }
 0x24a   :  { %856 = vlog2.f32 %v512_v61 }
 0x24b   :  { %858 = vrcp.f32 %v511_v59 }
 0x24c   :  { %860 = vpow2.f32 %v539_v1 }
 0x24e   :  { %v853_v4 = vpop.eup %852 }
 0x24f   :  { %v855_v5 = vpop.eup %854  ;;  %v530_v7 = vmul.f32 0.6931472, %v853_v4 }
 0x250   :  { %v857_v8 = vpop.eup %856  ;;  %v518_v9 = vmul.f32 %v855_v5, %v851_v58 }
 0x251   :  { %v859_v10 = vpop.eup %858  ;;  %v532_v12 = vmul.f32 0.6931472, %v857_v8  ;;  %v533_v13 = vadd.f32 %v530_v7, %v527_v6 }
 0x252   :  { %v517_v14 = vmul.f32 %v859_v10, %v849_v57  ;;  %v520_v15 = vsel %vm516_vm0, %v855_v5, %v518_v9  ;;  %v861_v21 = vpop.eup %860 }
 0x253   :  { %v534_v16 = vadd.f32 %v532_v12, %v528_v11  ;;  %522 = vst [vmem:[#allocation2 + $0x8] sm:$0xff] %v520_v15  ;;  %v541_v25 = vsub.f32 %v538_v23, %v861_v21 }
 0x254   :  { %v519_v18 = vsel %vm515_vm1, %v859_v10, %v517_v14 }
 0x255   :  { %v545_v19 = vadd.f32 %v534_v16, %v533_v13  ;;  %521 = vst [vmem:[#allocation2] sm:$0xff] %v519_v18  ;;  %v544_v27 = vsel %vm537_vm2, %v541_v25, %v543_v26 }
 0x256   :  { %578 = dma.vmem_to_hbm [thread:$0]  %s574_s9, 256, %s576_s24, [#allocation3]  }
 0x257   :  { %546 = vadd.xlane.f32.xlu0 %v545_v19 }
 0x25f   :  { %555 = vadd.xlane.f32.xlu0 %v544_v27 }
 0x2ca   :  { %v547_v28 = vpop.xlane.xlu0 %546 }
 0x2cb   :  { %v548_v29 = vrot.slane %v547_v28, 4 }
 0x2cd   :  { %v549_v30 = vadd.f32 %v548_v29, %v547_v28 }
 0x2cf   :  { %v550_v31 = vrot.slane %v549_v30, 2 }
 0x2d1   :  { %v551_v32 = vadd.f32 %v550_v31, %v549_v30 }
 0x2d2   :  { %v556_v20 = vpop.xlane.xlu0 %555 }
 0x2d3   :  { %v557_v33 = vrot.slane %v556_v20, 4  ;;  %v552_v34 = vrot.slane %v551_v32, 1 }
 0x2d5   :  { %v558_v35 = vadd.f32 %v557_v33, %v556_v20  ;;  %v553_v36 = vadd.f32 %v552_v34, %v551_v32 }
 0x2d7   :  { %v559_v37 = vrot.slane %v558_v35, 2  ;;  %839 = vpush %v553_v36 }
 0x2d9   :  { %v560_v38 = vadd.f32 %v559_v37, %v558_v35 }
 0x2db   :  { %v561_v39 = vrot.slane %v560_v38, 1 }
 0x2dd   :  { %v562_v40 = vadd.f32 %v561_v39, %v560_v38 }
 0x2df   :  { %841 = vpush %v562_v40 }
 0x308   :  { %s840_s10 = spop %839 }
 0x310   :  { %s842_s3 = spop %841 }
 0x311   :  { %s564_s27 = smul.f32 -0.5, %s842_s3 }
 0x313   :  { %s565_s28 = sadd.f32 %s840_s10, %s564_s27 }
 0x315   :  { %567 = sst [smem:[#allocation5]] %s565_s28 }
 0x316   :  { %587 = dma.smem_to_hbm %s903_s29, 16, %s585_s26, [#allocation4]  }
 0x317   :  { %898 = dma.done.wait [#allocation3], 256  }
 0x318   :  { %899 = vsyncadd [#allocation3], 4294967040 }
 0x319   :  { %900 = dma.done.wait [#allocation4], 16  }
 0x31a   :  { %901 = vsyncadd [#allocation4], 4294967280 }
 0x31b   :  { %596 = sfence }
 0x31c   :  { %597 = vsyncpa [#allocation3], 1 }
 0x31d   :  { %598 = vsyncpa [#allocation4], 1 }

</bundles_post_ra>
